<compile_context>
chip_gen: v7x
topology: tpu7x:2x2x1
jax: 0.10.0
libtpu: 0.0.40
codegen_flags: <defaults>
</compile_context>

<pallas_src>
import functools

import jax
import jax.numpy as jnp
from jax.experimental import pallas as pl
from jax.experimental.pallas import tpu as pltpu

LANES = 128
SUBLANES = 8
MAX_TILE_ROWS = 2048     # f32 tile = 1 MiB; 2 inputs x 2 buffers ~= 4 MiB VMEM
PAD_LOGIT = -30.0        # bce(-30, 0) == 0 exactly in f32 -> padded elems add 0


def _cdiv(a, b):
    return (a + b - 1) // b


def _round_up(a, m):
    return _cdiv(a, m) * m


def _focal_loss_kernel(x_ref, t_ref, out_ref, acc_ref, *, alpha, gamma, tile_rows):
    j = pl.program_id(1)  # reduction ("arbitrary") axis within this split

    @pl.when(j == 0)
    def _():
        acc_ref[...] = jnp.zeros_like(acc_ref)

    x = x_ref[...].astype(jnp.float32)
    t = t_ref[...].astype(jnp.float32)

    # Numerically stable BCE with logits (same formula PyTorch uses):
    #   bce = max(x, 0) - x*t + log(1 + exp(-|x|))
    bce = jnp.maximum(x, 0.0) - x * t + jnp.log(1.0 + jnp.exp(-jnp.abs(x)))
    pt = jnp.exp(-bce)
    w = 1.0 - pt

    # (1 - pt)**gamma: integer gamma -> repeated multiply (pure VPU); pow()
    # would add exp+log EUP transcendentals per element.
    if float(gamma).is_integer() and 0 <= int(gamma) <= 8:
        gi = int(gamma)
        if gi == 0:
            wg = jnp.ones_like(w)
        else:
            wg = w
            for _ in range(gi - 1):
                wg = wg * w
    else:
        wg = w ** jnp.float32(gamma)

    f = alpha * wg * bce

    # Fold the tile's sublane groups into a tiny (8, 128) accumulator.
    # Pure VPU vreg adds: no per-step cross-lane reduce, no SMEM RMW.
    acc_ref[...] += jnp.sum(
        f.reshape(tile_rows // SUBLANES, SUBLANES, LANES), axis=0)

    @pl.when(j == pl.num_programs(1) - 1)
    def _():
        out_ref[0] = acc_ref[...]


def focal_loss(logits, targets, *, alpha=0.25, gamma=2.0, size_average=True):
    assert logits.shape == targets.shape
    total = int(logits.size)

    # Pass inputs in native floating dtype (bf16 stays bf16 -> half the HBM
    # bytes); bool/int targets are promoted once here.
    def _as_float(a):
        return a if jnp.issubdtype(a.dtype, jnp.floating) else a.astype(jnp.float32)

    x_flat = _as_float(logits).reshape(-1)
    t_flat = _as_float(targets).reshape(-1)

    # --- tiling / split selection -------------------------------------------
    rows_raw = _cdiv(total, LANES)
    tile_rows0 = min(MAX_TILE_ROWS, _round_up(rows_raw, SUBLANES))
    tiles_total = _cdiv(rows_raw, tile_rows0)
    n_splits = 2 if tiles_total >= 2 else 1           # use both TCs on v7x
    tiles_per_split = _cdiv(tiles_total, n_splits)
    n_tiles = n_splits * tiles_per_split
    tile_rows = _round_up(_cdiv(rows_raw, n_tiles), SUBLANES)  # minimize padding
    rows_padded = n_tiles * tile_rows
    padded_total = rows_padded * LANES

    if padded_total != total:
        # Pad with (logit=-30, target=0): bce == 0 exactly, so padded elements
        # contribute exactly zero and no in-kernel masking is needed.
        x_flat = jnp.pad(x_flat, (0, padded_total - total),
                         constant_values=PAD_LOGIT)
        t_flat = jnp.pad(t_flat, (0, padded_total - total),
                         constant_values=0)

    x2 = x_flat.reshape(rows_padded, LANES)
    t2 = t_flat.reshape(rows_padded, LANES)

    kernel = functools.partial(
        _focal_loss_kernel,
        alpha=float(alpha), gamma=float(gamma), tile_rows=tile_rows)

    in_idx = lambda i, j: (i * tiles_per_split + j, 0)

    partials = pl.pallas_call(
        kernel,
        out_shape=jax.ShapeDtypeStruct((n_splits, SUBLANES, LANES), jnp.float32),
        grid_spec=pltpu.PrefetchScalarGridSpec(
            num_scalar_prefetch=0,
            grid=(n_splits, tiles_per_split),
            in_specs=[
                pl.BlockSpec((tile_rows, LANES), in_idx),
                pl.BlockSpec((tile_rows, LANES), in_idx),
            ],
            out_specs=pl.BlockSpec((1, SUBLANES, LANES), lambda i, j: (i, 0, 0)),
            scratch_shapes=[pltpu.VMEM((SUBLANES, LANES), jnp.float32)],
        ),
        compiler_params=pltpu.CompilerParams(
            dimension_semantics=("parallel", "arbitrary")),
    )(x2, t2)

    loss_sum = jnp.sum(partials)
    return loss_sum / total if size_average else loss_sum


def _focal_loss_ref(logits, targets, *, alpha=0.25, gamma=2.0, size_average=True):
    x = logits.astype(jnp.float32)
    t = targets.astype(jnp.float32)
    bce = jnp.maximum(x, 0.0) - x * t + jnp.log(1.0 + jnp.exp(-jnp.abs(x)))
    pt = jnp.exp(-bce)
    f = alpha * (1.0 - pt) ** gamma * bce
    return jnp.mean(f) if size_average else jnp.sum(f)


if __name__ == "__main__":
    # args.alpha / args.gamma from the module's __init__ -- fixed deterministically.
    # TODO(synk): args.gpu / torch.use_deterministic_algorithms is host/device
    # config with no kernel equivalent; omitted.
    ALPHA, GAMMA = 0.25, 2.0

    key = jax.random.PRNGKey(0)
    k_x, k_t, k_x2, k_t2 = jax.random.split(key, 4)

    # Input layout matches PyTorch NCHW: [batch=2, channels=4, H=16, W=16].
    logits = jax.random.normal(k_x, (2, 4, 16, 16), dtype=jnp.float32)
    targets = jax.random.bernoulli(k_t, p=0.3, shape=(2, 4, 16, 16)).astype(jnp.float32)

    loss = focal_loss(logits, targets, alpha=ALPHA, gamma=GAMMA, size_average=True)
    loss = jax.block_until_ready(loss)
    ref = _focal_loss_ref(logits, targets, alpha=ALPHA, gamma=GAMMA, size_average=True)
    assert jnp.allclose(loss, ref, rtol=1e-5, atol=1e-6), (loss, ref)

    # Odd size exercising the zero-contribution padding path (945 elements).
    logits2 = jax.random.normal(k_x2, (3, 5, 7, 9), dtype=jnp.float32)
    targets2 = jax.random.bernoulli(k_t2, p=0.5, shape=(3, 5, 7, 9)).astype(jnp.float32)
    loss2 = focal_loss(logits2, targets2, alpha=ALPHA, gamma=GAMMA, size_average=False)
    loss2 = jax.block_until_ready(loss2)
    ref2 = _focal_loss_ref(logits2, targets2, alpha=ALPHA, gamma=GAMMA, size_average=False)
    assert jnp.allclose(loss2, ref2, rtol=1e-5, atol=1e-5), (loss2, ref2)

    print("KERNEL_OK")
</pallas_src>

<mosaic_0001>
module attributes {stable_mosaic.version = 11 : i64} {
  func.func @_focal_loss_kernel(%arg0: i32, %arg1: i32, %arg2: memref<16x128xf32, #tpu.memory_space<vmem>>, %arg3: memref<16x128xf32, #tpu.memory_space<vmem>>, %arg4: memref<1x8x128xf32, #tpu.memory_space<vmem>>, %arg5: memref<8x128xf32, #tpu.memory_space<vmem>>) attributes {dimension_semantics = [#tpu.dimension_semantics<parallel>, #tpu.dimension_semantics<arbitrary>], iteration_bounds = array<i64: 1, 1>, scalar_prefetch = 0 : i64, scratch_operands = 1 : i64, tpu.core_type = #tpu.core_type<tc>, window_params = [{transform_indices = @transform_0, window_bounds = array<i64: 16, 128>}, {transform_indices = @transform_1, window_bounds = array<i64: 16, 128>}, {transform_indices = @transform_2, window_bounds = array<i64: 1, 8, 128>}]} {
    %c0_i32 = arith.constant 0 : i32
    %0 = arith.cmpi eq, %arg1, %c0_i32 : i32
    %1 = arith.extui %0 : i1 to i32
    %c0_i32_0 = arith.constant 0 : i32
    %2 = arith.cmpi ne, %1, %c0_i32_0 : i32
    scf.if %2 {
      %cst_16 = arith.constant 0.000000e+00 : f32
      %34 = vector.broadcast %cst_16 : f32 to vector<8x128xf32>
      %c0_17 = arith.constant 0 : index
      %c0_18 = arith.constant 0 : index
      %35 = vector.load %arg5[%c0_17, %c0_18] : memref<8x128xf32, #tpu.memory_space<vmem>>, vector<8x128xf32>
      tpu.vector_store %arg5[%c0_17, %c0_18], %34 {strides = array<i32>} : memref<8x128xf32, #tpu.memory_space<vmem>>, vector<8x128xf32>,
    } else {
    }
    %c0 = arith.constant 0 : index
    %c0_1 = arith.constant 0 : index
    %3 = vector.load %arg2[%c0, %c0_1] : memref<16x128xf32, #tpu.memory_space<vmem>>, vector<16x128xf32>
    %c0_2 = arith.constant 0 : index
    %c0_3 = arith.constant 0 : index
    %4 = vector.load %arg3[%c0_2, %c0_3] : memref<16x128xf32, #tpu.memory_space<vmem>>, vector<16x128xf32>
    %cst = arith.constant 0.000000e+00 : f32
    %5 = vector.broadcast %cst : f32 to vector<16x128xf32>
    %6 = arith.maximumf %3, %5 : vector<16x128xf32>
    %7 = arith.mulf %3, %4 : vector<16x128xf32>
    %8 = arith.subf %6, %7 : vector<16x128xf32>
    %9 = math.absf %3 : vector<16x128xf32>
    %cst_4 = arith.constant 0.000000e+00 : f32
    %10 = vector.broadcast %cst_4 : f32 to vector<16x128xf32>
    %11 = arith.subf %10, %9 : vector<16x128xf32>
    %12 = math.exp %11 : vector<16x128xf32>
    %cst_5 = arith.constant 1.000000e+00 : f32
    %13 = vector.broadcast %cst_5 : f32 to vector<16x128xf32>
    %14 = arith.addf %13, %12 : vector<16x128xf32>
    %15 = math.log %14 : vector<16x128xf32>
    %16 = arith.addf %8, %15 : vector<16x128xf32>
    %cst_6 = arith.constant 0.000000e+00 : f32
    %17 = vector.broadcast %cst_6 : f32 to vector<16x128xf32>
    %18 = arith.subf %17, %16 : vector<16x128xf32>
    %19 = math.exp %18 : vector<16x128xf32>
    %cst_7 = arith.constant 1.000000e+00 : f32
    %20 = vector.broadcast %cst_7 : f32 to vector<16x128xf32>
    %21 = arith.subf %20, %19 : vector<16x128xf32>
    %22 = arith.mulf %21, %21 : vector<16x128xf32>
    %cst_8 = arith.constant 2.500000e-01 : f32
    %23 = vector.broadcast %cst_8 : f32 to vector<16x128xf32>
    %24 = arith.mulf %23, %22 : vector<16x128xf32>
    %25 = arith.mulf %24, %16 : vector<16x128xf32>
    %c0_9 = arith.constant 0 : index
    %c0_10 = arith.constant 0 : index
    %26 = vector.load %arg5[%c0_9, %c0_10] : memref<8x128xf32, #tpu.memory_space<vmem>>, vector<8x128xf32>
    %27 = vector.shape_cast %25 : vector<16x128xf32> to vector<2x8x128xf32>
    %cst_11 = arith.constant dense<0.000000e+00> : vector<8x128xf32>
    %28 = vector.multi_reduction <add>, %27, %cst_11 [0] : vector<2x8x128xf32> to vector<8x128xf32>
    %29 = arith.addf %26, %28 : vector<8x128xf32>
    %c0_12 = arith.constant 0 : index
    %c0_13 = arith.constant 0 : index
    %30 = vector.load %arg5[%c0_12, %c0_13] : memref<8x128xf32, #tpu.memory_space<vmem>>, vector<8x128xf32>
    tpu.vector_store %arg5[%c0_12, %c0_13], %29 {strides = array<i32>} : memref<8x128xf32, #tpu.memory_space<vmem>>, vector<8x128xf32>,
    %c0_i32_14 = arith.constant 0 : i32
    %31 = arith.cmpi eq, %arg1, %c0_i32_14 : i32
    %32 = arith.extui %31 : i1 to i32
    %c0_i32_15 = arith.constant 0 : i32
    %33 = arith.cmpi ne, %32, %c0_i32_15 : i32
    scf.if %33 {
      %c0_16 = arith.constant 0 : index
      %c0_17 = arith.constant 0 : index
      %34 = vector.load %arg5[%c0_16, %c0_17] : memref<8x128xf32, #tpu.memory_space<vmem>>, vector<8x128xf32>
      %c0_18 = arith.constant 0 : index
      %c0_19 = arith.constant 0 : index
      %c0_20 = arith.constant 0 : index
      %35 = vector.load %arg4[%c0_18, %c0_19, %c0_20] : memref<1x8x128xf32, #tpu.memory_space<vmem>>, vector<1x8x128xf32>
      %36 = vector.shape_cast %35 : vector<1x8x128xf32> to vector<8x128xf32>
      %37 = vector.shape_cast %34 : vector<8x128xf32> to vector<1x8x128xf32>
      tpu.vector_store %arg4[%c0_18, %c0_19, %c0_20], %37 {strides = array<i32>} : memref<1x8x128xf32, #tpu.memory_space<vmem>>, vector<1x8x128xf32>,
    } else {
    }
    return
  }
  func.func @transform_0(%arg0: i32, %arg1: i32) -> (i32, i32) {
    %c1_i32 = arith.constant 1 : i32
    %0 = arith.muli %arg0, %c1_i32 : i32
    %1 = arith.addi %0, %arg1 : i32
    %c0_i32 = arith.constant 0 : i32
    %c0_i32_0 = arith.constant 0 : i32
    return %1, %c0_i32 : i32, i32
  }
  func.func @transform_1(%arg0: i32, %arg1: i32) -> (i32, i32) {
    %c1_i32 = arith.constant 1 : i32
    %0 = arith.muli %arg0, %c1_i32 : i32
    %1 = arith.addi %0, %arg1 : i32
    %c0_i32 = arith.constant 0 : i32
    %c0_i32_0 = arith.constant 0 : i32
    return %1, %c0_i32 : i32, i32
  }
  func.func @transform_2(%arg0: i32, %arg1: i32) -> (i32, i32, i32) {
    %c0_i32 = arith.constant 0 : i32
    %c0_i32_0 = arith.constant 0 : i32
    %c0_i32_1 = arith.constant 0 : i32
    return %arg0, %c0_i32, %c0_i32_0 : i32, i32, i32
  }
}

</mosaic_0001>

<bundles_post_ra>
// kernel: tpu_custom_call.1
= control target key start
LH: loop header
LB: loop body
LE: loop exit
PB: predicated region body
PF: predicated region fallthrough
CT: control target
= control target key end

     0   :  { %7 = vsyncpa [#allocation4], 0  ;;  %s267_s0 = inlined_call_operand.hbm [shape: f32[16,128], index: 0, kind: input, shape index: {}]   ;;  %s268_s1 = inlined_call_operand.hbm [shape: f32[16,128], index: 1, kind: input, shape index: {}]   ;;  %s269_s2 = inlined_call_operand.hbm [shape: f32[1,8,128], index: 2, kind: output, shape index: {}]  }
   0x1   :  { %8 = vsyncpa [#allocation7], 0 }
   0x2   :  { %9 = vsyncpa [#allocation5], 0  ;;  %s211_s9 = smov [#allocation3]   ;;  %s139_s13 = scalar_lea.hbm %s267_s0, 256 }
   0x3   :  { %s19_s10 = sshll.u32 %s211_s9, 4  ;;  %p140_p0 = scmp.ne.s32.totalorder %s267_s0, %s139_s13  ;;  %s20_s10 = int_to_ptr.vmem [resolvable:$true] %s19_s10 }
   0x4   :  { %p143_p1 = scmp.lt.u32.totalorder %s139_s13, %s267_s0 }
   0x6   :  { %p145_p2 = pnand %p143_p1, %p140_p0 }
   0x8   :  { %148 = shalt.err (!%p145_p2)
}
   0x9   :  { %s149_s18 = scalar_lea.vmem %s20_s10, 256  ;;  %p154_p4 = scmp.lt.s32.totalorder %s20_s10, %s20_s10 }
   0xa   :  { %p150_p3 = scmp.ne.s32.totalorder %s20_s10, %s149_s18  ;;  %p155_p5 = scmp.lt.s32.totalorder %s149_s18, %s149_s18 }
   0xc   :  { %p156_p6 = por %p155_p5, %p154_p4 }
   0xe   :  { %p157_p7 = pnand %p156_p6, %p150_p3 }
  0x10   :  { %160 = shalt.err (!%p157_p7)
}
  0x11   :  { %s212_s19 = smov 128   ;;  %s213_s20 = smov 8  }
  0x12   :  { %25 = dma.hbm_to_vmem [thread:$0]  %s267_s0, 256, %s20_s10, [#allocation4], %s212_s19, %s212_s19, %s213_s20  }
  0x13   :  { %s214_s23 = smov [#allocation6]   ;;  %s161_s27 = scalar_lea.hbm %s268_s1, 256 }
  0x14   :  { %s35_s24 = sshll.u32 %s214_s23, 4  ;;  %p162_p8 = scmp.ne.s32.totalorder %s268_s1, %s161_s27  ;;  %s36_s24 = int_to_ptr.vmem [resolvable:$true] %s35_s24 }
  0x15   :  { %p165_p9 = scmp.lt.u32.totalorder %s161_s27, %s268_s1 }
  0x17   :  { %p167_p10 = pnand %p165_p9, %p162_p8 }
  0x19   :  { %170 = shalt.err (!%p167_p10)
}
  0x1a   :  { %s171_s4 = scalar_lea.vmem %s36_s24, 256  ;;  %p176_p12 = scmp.lt.s32.totalorder %s36_s24, %s36_s24 }
  0x1b   :  { %p172_p11 = scmp.ne.s32.totalorder %s36_s24, %s171_s4  ;;  %p177_p13 = scmp.lt.s32.totalorder %s171_s4, %s171_s4 }
  0x1d   :  { %p178_p0 = por %p177_p13, %p176_p12 }
  0x1f   :  { %p179_p1 = pnand %p178_p0, %p172_p11 }
  0x21   :  { %182 = shalt.err (!%p179_p1)
}
  0x22   :  { %41 = dma.hbm_to_vmem [thread:$0]  %s268_s1, 256, %s36_s24, [#allocation7], %s212_s19, %s212_s19, %s213_s20  }
  0x23   :  { %205 = dma.done.wait [#allocation4], 256  }
  0x24   :  { %206 = vsyncadd [#allocation4], 4294967040 }
  0x25   :  { %207 = dma.done.wait [#allocation7], 256  }
  0x26   :  { %208 = vsyncadd [#allocation7], 4294967040  ;;  %v57_v0 = vld [vmem:[#allocation3] sm:$0xff]  ;;  %v58_v1 = vld [vmem:[#allocation3 + $0x8] sm:$0xff]  ;;  %s215_s1 = smov [#allocation8]  }
  0x27   :  { %v67_v2 = vand.u32 2147483647, %v57_v0  ;;  %v68_v3 = vand.u32 2147483647, %v58_v1  ;;  %v59_v12 = vld [vmem:[#allocation6] sm:$0xff]  ;;  %v60_v13 = vld [vmem:[#allocation6 + $0x8] sm:$0xff] }
  0x28   :  { %v61_v14 = vmax.f32 %v57_v0, 0.0  ;;  %v63_v15 = vmul.f32 %v59_v12, %v57_v0  ;;  %v62_v16 = vmax.f32 %v58_v1, 0.0  ;;  %v64_v17 = vmul.f32 %v60_v13, %v58_v1  ;;  %s112_s6 = sshll.u32 %s215_s1, 4  ;;  %s113_s6 = int_to_ptr.vmem [resolvable:$true] %s112_s6 }
  0x29   :  { %v69_v4 = vsub.f32 0.0, %v67_v2  ;;  %v70_v5 = vsub.f32 0.0, %v68_v3  ;;  %s183_s7 = scalar_lea.vmem %s113_s6, 128  ;;  %p188_p3 = scmp.lt.s32.totalorder %s113_s6, %s113_s6 }
  0x2a   :  { %v65_v18 = vsub.f32 %v61_v14, %v63_v15  ;;  %v66_v20 = vsub.f32 %v62_v16, %v64_v17  ;;  %p184_p2 = scmp.ne.s32.totalorder %s113_s6, %s183_s7  ;;  %p189_p4 = scmp.lt.s32.totalorder %s183_s7, %s183_s7 }
  0x2b   :  { %v71_v6 = vmul.f32 1.442695, %v69_v4  ;;  %v73_v7 = vmul.f32 1.442695, %v70_v5 }
  0x2c   :  { %p190_p5 = por %p189_p4, %p188_p3 }
  0x2d   :  { %127 = vpow2.f32 %v71_v6 }
  0x2e   :  { %129 = vpow2.f32 %v73_v7  ;;  %p191_p6 = pnand %p190_p5, %p184_p2 }
  0x37   :  { %v128_v8 = vpop.eup %127 }
  0x38   :  { %v130_v9 = vpop.eup %129  ;;  %v75_v10 = vadd.f32 1.0, %v128_v8 }
  0x39   :  { %v76_v11 = vadd.f32 1.0, %v130_v9 }
  0x3a   :  { %131 = vlog2.f32 %v75_v10 }
  0x3b   :  { %133 = vlog2.f32 %v76_v11 }
  0x44   :  { %v132_v19 = vpop.eup %131 }
  0x45   :  { %v134_v21 = vpop.eup %133  ;;  %v78_v22 = vmul.f32 0.6931472, %v132_v19 }
  0x46   :  { %v80_v23 = vmul.f32 0.6931472, %v134_v21 }
  0x47   :  { %v81_v24 = vadd.f32 %v78_v22, %v65_v18 }
  0x48   :  { %v82_v25 = vadd.f32 %v80_v23, %v66_v20 }
  0x49   :  { %v83_v26 = vsub.f32 0.0, %v81_v24 }
  0x4a   :  { %v84_v27 = vsub.f32 0.0, %v82_v25 }
  0x4b   :  { %v85_v28 = vmul.f32 1.442695, %v83_v26 }
  0x4c   :  { %v87_v29 = vmul.f32 1.442695, %v84_v27 }
  0x4d   :  { %135 = vpow2.f32 %v85_v28 }
  0x4e   :  { %137 = vpow2.f32 %v87_v29 }
  0x57   :  { %v136_v30 = vpop.eup %135 }
  0x58   :  { %v138_v31 = vpop.eup %137  ;;  %v89_v32 = vsub.f32 1.0, %v136_v30 }
  0x59   :  { %v90_v33 = vsub.f32 1.0, %v138_v31 }
  0x5a   :  { %v91_v34 = vmul.f32 %v89_v32, %v89_v32 }
  0x5b   :  { %v92_v35 = vmul.f32 %v90_v33, %v90_v33 }
  0x5c   :  { %v93_v36 = vmul.f32 0.25, %v91_v34 }
  0x5d   :  { %v94_v37 = vmul.f32 0.25, %v92_v35 }
  0x5e   :  { %v95_v38 = vmul.f32 %v93_v36, %v81_v24 }
  0x5f   :  { %v96_v39 = vmul.f32 %v94_v37, %v82_v25 }
  0x61   :  { %v98_v40 = vadd.f32 %v96_v39, %v95_v38 }
  0x63   :  { %105 = vst [vmem:[#allocation8] sm:$0xff] %v98_v40 }
  0x64   :  { %194 = shalt.err (!%p191_p6)
}
  0x65   :  { %s195_s10 = scalar_lea.hbm %s269_s2, 128 }
  0x66   :  { %p196_p7 = scmp.ne.s32.totalorder %s269_s2, %s195_s10  ;;  %p199_p8 = scmp.lt.u32.totalorder %s195_s10, %s269_s2 }
  0x68   :  { %p201_p9 = pnand %p199_p8, %p196_p7 }
  0x6a   :  { %204 = shalt.err (!%p201_p9)
}
  0x6b   :  { %115 = dma.vmem_to_hbm [thread:$0]  %s113_s6, 128, %s269_s2, [#allocation5]  }
  0x6c   :  { %209 = dma.done.wait [#allocation5], 128  }
  0x6d   :  { %210 = vsyncadd [#allocation5], 4294967168 }
  0x6e   :  { %119 = vsyncpa [#allocation4], 1 }
  0x6f   :  { %120 = vsyncpa [#allocation7], 1 }
  0x70   :  { %121 = vsyncpa [#allocation5], 1 }

</bundles_post_ra>
